<compile_context>
chip_gen: v5e
topology: v5e:2x2
jax: 0.10.0
libtpu: 0.0.40
codegen_flags: <defaults>
</compile_context>

<pallas_src>
import math
import functools

import jax
import jax.numpy as jnp
from jax import lax
from jax.experimental import pallas as pl
from jax.experimental.pallas import tpu as pltpu

_LANE = 128


def _make_pos_encoding(max_seq_len: int, d_model: int) -> jnp.ndarray:
    """Deterministic sin/cos positional-encoding table, same as the torch __init__."""
    position = jnp.arange(max_seq_len, dtype=jnp.float32)[:, None]            # (L, 1)
    div_term = jnp.exp(
        jnp.arange(0, d_model, 2, dtype=jnp.float32) * (-math.log(10000.0) / d_model)
    )                                                                          # (D/2,)
    pe = jnp.zeros((max_seq_len, d_model), dtype=jnp.float32)
    pe = pe.at[:, 0::2].set(jnp.sin(position * div_term))
    pe = pe.at[:, 1::2].set(jnp.cos(position * div_term))
    return pe


def _pe_kernel(seed_ref, x_ref, pe_ref, o_ref, *, p: float, training: bool, n_flat: int):
    # x_ref / o_ref block: (B, TF); pe_ref block: (1, TF) -> sublane broadcast add.
    y = x_ref[...] + pe_ref[...]

    if training and p > 0.0:
        b, tf = x_ref.shape
        # Counter-based PRNG: hash(global element index, seed) -> 32 random bits.
        col = lax.broadcasted_iota(jnp.uint32, (b, tf), 1)
        row = lax.broadcasted_iota(jnp.uint32, (b, tf), 0)
        base = (pl.program_id(0) * tf).astype(jnp.uint32)
        ctr = row * jnp.uint32(n_flat) + base + col
        h = ctr ^ (seed_ref[0].astype(jnp.uint32) * jnp.uint32(0x9E3779B9))
        # lowbias32 finalizer (good avalanche, pure VPU integer ops).
        h = h ^ (h >> 16)
        h = h * jnp.uint32(0x7FEB352D)
        h = h ^ (h >> 15)
        h = h * jnp.uint32(0x846CA68B)
        h = h ^ (h >> 16)
        # Integer-threshold compare: P(drop) = p to 2^-32 resolution.
        thresh = jnp.uint32(min(int(round(p * 2.0 ** 32)), 2 ** 32 - 1))
        keep = h >= thresh
        y = jnp.where(keep, y * (1.0 / (1.0 - p)), jnp.zeros_like(y))

    o_ref[...] = y.astype(o_ref.dtype)


def positional_encoding_forward(x, pe_full, *, p: float = 0.1,
                                training: bool = False, seed: int = 0):
    """x: (B, S, D) float32, pe_full: (max_seq_len, D) float32."""
    B, S, D = x.shape
    N = S * D

    # Lane-dense flattening: last dim of every block becomes a multiple of 128
    # (or the full extent), avoiding masked partial stores when D < 128.
    x2 = x.reshape(B, N)
    pe2 = pe_full[:S, :].astype(x.dtype).reshape(1, N)   # self.pe[:, :x.size(1)]

    # Tile the flattened axis: ~2 MiB per x tile (generation-safe for v7x's
    # 64 MiB VMEM with double-buffered in/out + pe), lane-aligned.
    budget_elems = (2 * 1024 * 1024) // x.dtype.itemsize
    tf = (budget_elems // max(B, 1)) // _LANE * _LANE
    tf = max(tf, _LANE)
    if tf >= N:
        tf = N                      # single full-width block (always layout-legal)
    grid_n = pl.cdiv(N, tf)

    seed_arr = jnp.array([seed], dtype=jnp.int32)
    kernel = functools.partial(_pe_kernel, p=float(p), training=bool(training), n_flat=N)

    y2 = pl.pallas_call(
        kernel,
        out_shape=jax.ShapeDtypeStruct((B, N), x.dtype),
        grid_spec=pltpu.PrefetchScalarGridSpec(
            num_scalar_prefetch=1,                      # seed lands in SMEM
            grid=(grid_n,),
            in_specs=[
                pl.BlockSpec((B, tf), lambda i, seed: (0, i)),   # x: all batch rows, one tile
                pl.BlockSpec((1, tf), lambda i, seed: (0, i)),   # pe: one tile, broadcast over B
            ],
            out_specs=pl.BlockSpec((B, tf), lambda i, seed: (0, i)),
        ),
        compiler_params=pltpu.CompilerParams(
            dimension_semantics=("parallel",),          # independent tiles -> both TCs on v7x
        ),
    )(seed_arr, x2, pe2)

    return y2.reshape(B, S, D)


if __name__ == "__main__":
    # Small shapes consistent with the module: batch=2, seq=8, d_model=32, max_seq_len=100.
    B, S, D = 2, 8, 32
    MAX_SEQ_LEN = 100

    key = jax.random.PRNGKey(0)
    x = jax.random.normal(key, (B, S, D), dtype=jnp.float32)
    pe_full = _make_pos_encoding(MAX_SEQ_LEN, D)

    # Eval mode (dropout = identity): exact numerical check vs reference.
    y_eval = positional_encoding_forward(x, pe_full, training=False)
    jax.block_until_ready(y_eval)
    ref = x + pe_full[None, :S, :]
    assert jnp.allclose(y_eval, ref, atol=1e-6), "eval-mode mismatch vs reference"

    # Training mode: dropout with p=0.1, elementwise scale 1/(1-p).
    p = 0.1
    y_train = positional_encoding_forward(x, pe_full, p=p, training=True, seed=42)
    jax.block_until_ready(y_train)
    assert y_train.shape == (B, S, D)
    scaled = ref / (1.0 - p)
    is_zero = jnp.abs(y_train) <= 1e-6
    is_scaled = jnp.abs(y_train - scaled) <= 1e-5 * (1.0 + jnp.abs(scaled))
    assert bool(jnp.all(is_zero | is_scaled)), "training-mode values not in {0, (x+pe)/(1-p)}"
    keep_frac = float(jnp.mean(is_scaled.astype(jnp.float32)))
    assert 0.75 <= keep_frac <= 0.995, f"dropout keep fraction {keep_frac} far from {1.0 - p}"

    print("KERNEL_OK")
</pallas_src>

<mosaic_0001>
module attributes {stable_mosaic.version = 11 : i64} {
  func.func @_pe_kernel(%arg0: i32, %arg1: memref<1xi32, #tpu.memory_space<smem>>, %arg2: memref<2x256xf32, #tpu.memory_space<vmem>>, %arg3: memref<1x256xf32, #tpu.memory_space<vmem>>, %arg4: memref<2x256xf32, #tpu.memory_space<vmem>>) attributes {dimension_semantics = [#tpu.dimension_semantics<parallel>], iteration_bounds = array<i64: 1>, scalar_prefetch = 1 : i64, scratch_operands = 0 : i64, tpu.core_type = #tpu.core_type<tc>, window_params = [{transform_indices = @transform_0, window_bounds = array<i64: 2, 256>}, {transform_indices = @transform_1, window_bounds = array<i64: 1, 256>}, {transform_indices = @transform_2, window_bounds = array<i64: 2, 256>}]} {
    %c0 = arith.constant 0 : index
    %c0_0 = arith.constant 0 : index
    %0 = vector.load %arg2[%c0, %c0_0] : memref<2x256xf32, #tpu.memory_space<vmem>>, vector<2x256xf32>
    %c0_1 = arith.constant 0 : index
    %c0_2 = arith.constant 0 : index
    %1 = vector.load %arg3[%c0_1, %c0_2] : memref<1x256xf32, #tpu.memory_space<vmem>>, vector<1x256xf32>
    %2 = vector.broadcast %1 : vector<1x256xf32> to vector<2x256xf32>
    %3 = arith.addf %0, %2 : vector<2x256xf32>
    %c0_3 = arith.constant 0 : index
    %c0_4 = arith.constant 0 : index
    %4 = vector.load %arg4[%c0_3, %c0_4] : memref<2x256xf32, #tpu.memory_space<vmem>>, vector<2x256xf32>
    tpu.vector_store %arg4[%c0_3, %c0_4], %3 {strides = array<i32>} : memref<2x256xf32, #tpu.memory_space<vmem>>, vector<2x256xf32>,
    return
  }
  func.func @transform_0(%arg0: i32, %arg1: memref<1xi32, #tpu.memory_space<smem>>) -> (i32, i32) {
    %c0_i32 = arith.constant 0 : i32
    %c0_i32_0 = arith.constant 0 : i32
    return %c0_i32, %arg0 : i32, i32
  }
  func.func @transform_1(%arg0: i32, %arg1: memref<1xi32, #tpu.memory_space<smem>>) -> (i32, i32) {
    %c0_i32 = arith.constant 0 : i32
    %c0_i32_0 = arith.constant 0 : i32
    return %c0_i32, %arg0 : i32, i32
  }
  func.func @transform_2(%arg0: i32, %arg1: memref<1xi32, #tpu.memory_space<smem>>) -> (i32, i32) {
    %c0_i32 = arith.constant 0 : i32
    %c0_i32_0 = arith.constant 0 : i32
    return %c0_i32, %arg0 : i32, i32
  }
}

</mosaic_0001>

<bundles_post_ra>
// kernel: tpu_custom_call.1
= control target key start
LH: loop header
LB: loop body
LE: loop exit
PB: predicated region body
PF: predicated region fallthrough
CT: control target
= control target key end

     0   :  { %9 = vsyncpa [#allocation5], 0  ;;  %s141_s0 = inlined_call_operand.<no memory space> [shape: s32[1], index: 0, kind: input, shape index: {}]   ;;  %s142_s1 = inlined_call_operand.hbm [shape: f32[2,256], index: 1, kind: input, shape index: {}]   ;;  %s143_s2 = inlined_call_operand.vmem [shape: f32[1,256], index: 2, kind: input, shape index: {}]   ;;  %s144_s3 = inlined_call_operand.hbm [shape: f32[2,256], index: 3, kind: output, shape index: {}]  }
   0x1   :  { %10 = vsyncpa [#allocation6], 0  ;;  %s16_s14 = sshll.u32 %s142_s1, 4  ;;  %s110_s15 = smov [#allocation4]   ;;  %s17_s14 = int_to_ptr.hbm [resolvable:$true] %s16_s14 }
   0x2   :  { %s18_s16 = sshll.u32 %s110_s15, 4  ;;  %s19_s16 = int_to_ptr.vmem [resolvable:$true] %s18_s16 }
   0x3   :  { %21 = dma.hbm_to_vmem [thread:$0]  %s17_s14, 64, %s19_s16, [#allocation5]  }
   0x4   :  { %106 = dma.done.wait [#allocation5], 64  }
   0x5   :  { %107 = vsyncadd [#allocation5], 4294967232  ;;  %v29_v0 = vld [vmem:[%s143_s2] sm:$0x3]  ;;  %vm34_vm0 = vcmask 1041408   ;;  %s111_s18 = smov [#allocation7]  }
   0x6   :  { %v31_v1 = vperm.slane %v29_v0, 0  ;;  %v32_v2 = vperm.slane %v29_v0, 1  ;;  %v28_v3 = vld [vmem:[#allocation4] sm:$0xf]  ;;  %s44_s19 = sshll.u32 %s111_s18, 4  ;;  %s46_s21 = sshll.u32 %s144_s3, 4  ;;  %s45_s19 = int_to_ptr.vmem [resolvable:$true] %s44_s19  ;;  %s47_s21 = int_to_ptr.hbm [resolvable:$true] %s46_s21 }
   0x8   :  { %v33_v4 = vrot.slane %v32_v2, 6 }
   0xa   :  { %v35_v5 = vsel %vm34_vm0, %v31_v1, %v33_v4 }
   0xb   :  { %v37_v6 = vadd.f32 %v35_v5, %v28_v3 }
   0xd   :  { %38 = vst [vmem:[#allocation7] sm:$0xf] %v37_v6 }
   0xe   :  { %49 = dma.vmem_to_hbm [thread:$0]  %s45_s19, 64, %s47_s21, [#allocation6]  }
   0xf   :  { %108 = dma.done.wait [#allocation6], 64  }
  0x10   :  { %109 = vsyncadd [#allocation6], 4294967232 }
  0x11   :  { %54 = vsyncpa [#allocation5], 1 }
  0x12   :  { %55 = vsyncpa [#allocation6], 1 }

</bundles_post_ra>
